<compile_context>
chip_gen: v5e
topology: v5e:2x2
jax: 0.10.0
libtpu: 0.0.40
codegen_flags: <defaults>
</compile_context>

<pallas_src>
import jax
import jax.numpy as jnp
import numpy as np
from jax.experimental import pallas as pl
from jax.experimental.pallas import tpu as pltpu


def _gtn_fused_kernel(scales_ref, a_ref, h_ref):
    """One grid step == one GT layer. h_ref is the VMEM-resident running H."""
    layer = pl.program_id(0)
    A = a_ref[...]

    @pl.when(layer == 0)
    def _():
        # H = (s1*A) @ (s2*A) == (s1*s2) * (A @ A); scale folded after the matmul.
        h_ref[...] = scales_ref[0] * jnp.dot(
            A, A, preferred_element_type=jnp.float32)

    @pl.when(layer > 0)
    def _():
        H = h_ref[...]
        # deg = rowsum(H + I) = rowsum(H) + 1  (identity folded, no eye built).
        deg = jnp.sum(H, axis=1, keepdims=True) + 1.0
        deg = jnp.where(deg <= 1e-10, 1.0, deg)          # deg[deg <= 1e-10] = 1
        inv_deg = pl.reciprocal(deg, approx=False)       # (N, 1) row scales
        s = scales_ref[layer]
        # Hn @ (s*A) = s * diag(1/deg) @ ((H + I) @ A) = (s*inv_deg) * (H@A + A)
        h_ref[...] = (s * inv_deg) * (
            jnp.dot(H, A, preferred_element_type=jnp.float32) + A)


def gtn_forward(A, weights):
    """A: (N, N) float32.
    weights: [(w1, w2), (w1,), (w1,), ...], each w of shape (2, 1, 1, 1).
    Returns H of shape (1, N, N), matching the PyTorch module output."""
    N = A.shape[0]
    L = len(weights)
    A = A.astype(jnp.float32)

    def conv_scale(w):
        # GTConv collapses to a scalar scale of A: sum_k softmax(w, dim=1)[k].
        return jnp.sum(jax.nn.softmax(w, axis=1))

    s_list = [conv_scale(weights[0][0]) * conv_scale(weights[0][1])]
    s_list += [conv_scale(ws[0]) for ws in weights[1:]]
    scales = jnp.stack(s_list).astype(jnp.float32)       # (L,)

    # Whole-matrix resident design: A + H(out) + a few f32 temporaries in VMEM.
    vmem_need = 8 * N * N * 4
    vmem_limit = int(min(64 * 2**20, max(16 * 2**20, vmem_need)))
    if vmem_need > 64 * 2**20:  # keep within v7x physical VMEM as well
        raise ValueError(
            f"N={N} too large for the whole-matrix resident GTN kernel; "
            "a tiled 3-D-grid matmul variant is required.")

    mat_spec = pl.BlockSpec((N, N), lambda l: (0, 0))    # constant -> resident
    smem_spec = pl.BlockSpec(memory_space=pltpu.MemorySpace.SMEM)

    H = pl.pallas_call(
        _gtn_fused_kernel,
        out_shape=jax.ShapeDtypeStruct((N, N), jnp.float32),
        grid=(L,),
        in_specs=[smem_spec, mat_spec],
        out_specs=mat_spec,
        compiler_params=pltpu.CompilerParams(
            dimension_semantics=("arbitrary",),
            vmem_limit_bytes=vmem_limit,
        ),
    )(scales, A)

    return H[None, :, :]                                 # torch returns (1, N, N)


def _ref_forward(A, weights):
    """Pure-JAX reference reproducing the PyTorch forward literally."""
    A4 = A[None, None]                                   # A.unsqueeze(0) -> 4D bcast

    def conv(w):
        sw = jax.nn.softmax(w, axis=1)                   # (2,1,1,1)
        return jnp.sum(A4 * sw, axis=0)                  # (1, N, N)

    def norm(Hm):
        n = Hm.shape[0]
        Hm = Hm + jnp.eye(n, dtype=Hm.dtype)
        deg = jnp.sum(Hm, axis=1)
        deg = jnp.where(deg <= 1e-10, 1.0, deg)
        return jnp.matmul(jnp.diag(1.0 / deg), Hm)

    H = None
    for i, ws in enumerate(weights):
        if i == 0:
            a = conv(ws[0])
            b = conv(ws[1])
            H = jnp.matmul(a, b)
        else:
            Hn = norm(H[0])[None]
            a = conv(ws[0])
            H = jnp.matmul(Hn, a)
    return H


if __name__ == "__main__":
    N = 128            # small, lane-dense and (8,128)-aligned
    num_layers = 3

    key = jax.random.PRNGKey(0)
    k_a, k_w = jax.random.split(key)
    A = jax.random.uniform(k_a, (N, N), dtype=jnp.float32)

    # nn.init.normal_ on weights of shape (2, 1, 1, 1), deterministic.
    wkeys = jax.random.split(k_w, 2 * num_layers)
    weights = []
    for i in range(num_layers):
        if i == 0:
            weights.append(
                (jax.random.normal(wkeys[0], (2, 1, 1, 1), jnp.float32),
                 jax.random.normal(wkeys[1], (2, 1, 1, 1), jnp.float32)))
        else:
            weights.append(
                (jax.random.normal(wkeys[2 * i], (2, 1, 1, 1), jnp.float32),))

    H = jax.block_until_ready(gtn_forward(A, weights))
    H_ref = jax.block_until_ready(_ref_forward(A, weights))

    assert H.shape == (1, N, N)
    # Tolerance covers the f32 reassociation from folding the scalar scales and
    # identity add across the matmuls (mathematically identical).
    np.testing.assert_allclose(np.asarray(H), np.asarray(H_ref),
                               rtol=2e-4, atol=2e-4)

    print("KERNEL_OK")
</pallas_src>

<mosaic_0001>
module attributes {stable_mosaic.version = 11 : i64} {
  func.func @_gtn_fused_kernel(%arg0: i32, %arg1: memref<3xf32, #tpu.memory_space<smem>>, %arg2: memref<128x128xf32, #tpu.memory_space<vmem>>, %arg3: memref<128x128xf32, #tpu.memory_space<vmem>>) attributes {dimension_semantics = [#tpu.dimension_semantics<arbitrary>], iteration_bounds = array<i64: 3>, scalar_prefetch = 0 : i64, scratch_operands = 0 : i64, tpu.core_type = #tpu.core_type<tc>, window_params = [{transform_indices = @transform_0, window_bounds = array<i64: 3>}, {pipeline_mode = #tpu.pipeline_mode<synchronous>, transform_indices = @transform_1, window_bounds = array<i64: 128, 128>}, {pipeline_mode = #tpu.pipeline_mode<synchronous>, transform_indices = @transform_2, window_bounds = array<i64: 128, 128>}]} {
    %c0 = arith.constant 0 : index
    %c0_0 = arith.constant 0 : index
    %0 = vector.load %arg2[%c0, %c0_0] : memref<128x128xf32, #tpu.memory_space<vmem>>, vector<128x128xf32>
    %c0_i32 = arith.constant 0 : i32
    %1 = arith.cmpi eq, %arg0, %c0_i32 : i32
    %2 = arith.extui %1 : i1 to i32
    %c0_i32_1 = arith.constant 0 : i32
    %3 = arith.cmpi ne, %2, %c0_i32_1 : i32
    scf.if %3 {
      %c0_4 = arith.constant 0 : index
      %7 = memref.load %arg1[%c0_4] : memref<3xf32, #tpu.memory_space<smem>>
      %cst = arith.constant dense<0.000000e+00> : vector<128x128xf32>
      %8 = tpu.matmul %0, %0, %cst {dimension_numbers = #tpu.dot_dimension_numbers<[1], [0], [0], [1], [0, 0, 1, 1], [], []>} : vector<128x128xf32>, vector<128x128xf32>, vector<128x128xf32> -> vector<128x128xf32>
      %9 = vector.broadcast %7 : f32 to vector<128x128xf32>
      %10 = arith.mulf %9, %8 : vector<128x128xf32>
      %c0_5 = arith.constant 0 : index
      %c0_6 = arith.constant 0 : index
      %11 = vector.load %arg3[%c0_5, %c0_6] : memref<128x128xf32, #tpu.memory_space<vmem>>, vector<128x128xf32>
      tpu.vector_store %arg3[%c0_5, %c0_6], %10 {strides = array<i32>} : memref<128x128xf32, #tpu.memory_space<vmem>>, vector<128x128xf32>,
    } else {
    }
    %c0_i32_2 = arith.constant 0 : i32
    %4 = arith.cmpi sgt, %arg0, %c0_i32_2 : i32
    %5 = arith.extui %4 : i1 to i32
    %c0_i32_3 = arith.constant 0 : i32
    %6 = arith.cmpi ne, %5, %c0_i32_3 : i32
    scf.if %6 {
      %c0_4 = arith.constant 0 : index
      %c0_5 = arith.constant 0 : index
      %7 = vector.load %arg3[%c0_4, %c0_5] : memref<128x128xf32, #tpu.memory_space<vmem>>, vector<128x128xf32>
      %cst = arith.constant dense<0.000000e+00> : vector<128xf32>
      %8 = vector.multi_reduction <add>, %7, %cst [1] : vector<128x128xf32> to vector<128xf32>
      %9 = vector.shape_cast %8 : vector<128xf32> to vector<128x1xf32>
      %cst_6 = arith.constant 1.000000e+00 : f32
      %10 = vector.broadcast %cst_6 : f32 to vector<128x1xf32>
      %11 = arith.addf %9, %10 : vector<128x1xf32>
      %cst_7 = arith.constant 1.000000e-10 : f32
      %12 = vector.broadcast %cst_7 : f32 to vector<128x1xf32>
      %13 = arith.cmpf ole, %11, %12 : vector<128x1xf32>
      %cst_8 = arith.constant 1.000000e+00 : f32
      %14 = vector.broadcast %cst_8 : f32 to vector<128x1xf32>
      %15 = arith.select %13, %14, %11 : vector<128x1xi1>, vector<128x1xf32>
      %16 = tpu.reciprocal %15 : vector<128x1xf32> -> vector<128x1xf32>
      %17 = arith.index_cast %arg0 : i32 to index
      %18 = memref.load %arg1[%17] : memref<3xf32, #tpu.memory_space<smem>>
      %19 = vector.broadcast %18 : f32 to vector<128x1xf32>
      %20 = arith.mulf %19, %16 : vector<128x1xf32>
      %cst_9 = arith.constant dense<0.000000e+00> : vector<128x128xf32>
      %21 = tpu.matmul %7, %0, %cst_9 {dimension_numbers = #tpu.dot_dimension_numbers<[1], [0], [0], [1], [0, 0, 1, 1], [], []>} : vector<128x128xf32>, vector<128x128xf32>, vector<128x128xf32> -> vector<128x128xf32>
      %22 = arith.addf %21, %0 : vector<128x128xf32>
      %23 = vector.broadcast %20 : vector<128x1xf32> to vector<128x128xf32>
      %24 = arith.mulf %23, %22 : vector<128x128xf32>
      %c0_10 = arith.constant 0 : index
      %c0_11 = arith.constant 0 : index
      %25 = vector.load %arg3[%c0_10, %c0_11] : memref<128x128xf32, #tpu.memory_space<vmem>>, vector<128x128xf32>
      tpu.vector_store %arg3[%c0_10, %c0_11], %24 {strides = array<i32>} : memref<128x128xf32, #tpu.memory_space<vmem>>, vector<128x128xf32>,
    } else {
    }
    return
  }
  func.func @transform_0(%arg0: i32) -> i32 {
    %c0_i32 = arith.constant 0 : i32
    %c0_i32_0 = arith.constant 0 : i32
    return %c0_i32 : i32
  }
  func.func @transform_1(%arg0: i32) -> (i32, i32) {
    %c0_i32 = arith.constant 0 : i32
    %c0_i32_0 = arith.constant 0 : i32
    %c0_i32_1 = arith.constant 0 : i32
    return %c0_i32, %c0_i32_0 : i32, i32
  }
  func.func @transform_2(%arg0: i32) -> (i32, i32) {
    %c0_i32 = arith.constant 0 : i32
    %c0_i32_0 = arith.constant 0 : i32
    %c0_i32_1 = arith.constant 0 : i32
    return %c0_i32, %c0_i32_0 : i32, i32
  }
}

</mosaic_0001>

<bundles_post_ra>
// kernel: tpu_custom_call.1
= control target key start
LH: loop header
LB: loop body
LE: loop exit
PB: predicated region body
PF: predicated region fallthrough
CT: control target
= control target key end

     0   :  { %7 = vsyncpa [#allocation5], 0  ;;  %s1805_s0 = inlined_call_operand.hbm [shape: f32[3], index: 0, kind: input, shape index: {}]   ;;  %s1806_s1 = inlined_call_operand.hbm [shape: f32[128,128], index: 1, kind: input, shape index: {}]   ;;  %s1807_s2 = inlined_call_operand.hbm [shape: f32[128,128], index: 2, kind: output, shape index: {}]  }
   0x1   :  { %8 = vsyncpa [#allocation3], 0 }
   0x2   :  { %9 = vsyncpa [#allocation4], 0  ;;  %s1057_s9 = smov 0  }
   0x3 LB: > { %s95_s12 = sshll.u32 %s1805_s0, 4  ;;  %s1066_s13 = sadd.s32 4294967295, %s1033_s9   ;;  %s1033_s9 = sphi %s1057_s9, %s15_s9   ;;  %s96_s12 = int_to_ptr.hbm [resolvable:$true] %s95_s12 }
   0x4   : > { %p762_p0 = scmp.ge.s32.totalorder %s1033_s9, 1  ;;  %p83_p1 = scmp.lt.s32.totalorder %s1033_s9, 4 }
   0x5   : > { %p763_p2 = scmp.ne.s32.totalorder %s1066_s13, 0  ;;  %p889_p3 = scmp.eq.s32.totalorder %s1066_s13, 0 }
   0x6   : > { %p1072_p4 = pnand %p762_p0, %p83_p1  ;;  %s104_s17 = sshll.u32 %s1806_s1, 4  ;;  %s105_s17 = int_to_ptr.hbm [resolvable:$true] %s104_s17 }
   0x7   : > { %s1035_s18 = smov [#allocation6]   ;;  %s1036_s20 = smov [#allocation2]  }
   0x8   : > { %p882_p5 = pneg %p1072_p4  ;;  %s106_s19 = sshll.u32 %s1035_s18, 4  ;;  %s107_s19 = int_to_ptr.vmem [resolvable:$true] %s106_s19 }
   0x9   : > { %s1037_s21 = smov 128   ;;  %s1038_s22 = smov 8  }
   0xa   : > { %p883_p6 = pnand %p889_p3, %p882_p5  ;;  %122 = sbr.rel (%p1072_p4) target bundleno = 438 (0x1b6), region = 28 }
   0xc   : > { %885 = dma.hbm_to_smem (!%p883_p6), %s96_s12, 16, %s1036_s20, [#allocation5]  }
   0xd   : > { %888 = dma.hbm_to_vmem [thread:$0]  (!%p883_p6), %s105_s17, 2048, %s107_s19, [#allocation3], %s1037_s21, %s1037_s21, %s1038_s22  }
   0xf   : > { %1020 = dma.done.wait (%p889_p3), [#allocation5], 16  }
  0x10   : > { %1022 = vsyncadd (%p889_p3), [#allocation5], 4294967280 }
  0x11   : > { %1024 = dma.done.wait (%p889_p3), [#allocation3], 2048  }
  0x12   : > { %1026 = vsyncadd (%p889_p3), [#allocation3], 4294965248 }
  0x13   : > { %134 = sfence }
  0x14   : > { %v1093_v0 = vld [vmem:[#allocation6] sm:$0xff]  ;;  %v1095_v1 = vld [vmem:[#allocation6 + $0x8] sm:$0xff]  ;;  %v1097_v2 = vld [vmem:[#allocation6 + $0x10] sm:$0xff]  ;;  %s161_s23 = sld [smem:[#allocation2]] (!%p763_p2) }
  0x15   : > { %v1099_v3 = vld [vmem:[#allocation6 + $0x18] sm:$0xff]  ;;  %v1101_v4 = vld [vmem:[#allocation6 + $0x20] sm:$0xff]  ;;  %v1103_v5 = vld [vmem:[#allocation6 + $0x28] sm:$0xff] }
  0x16   : > { %1818 = vst [vmem:[#allocation11_spill] sm:$0xff] %v1099_v3  ;;  %v1105_v6 = vld [vmem:[#allocation6 + $0x30] sm:$0xff]  ;;  %v1107_v7 = vld [vmem:[#allocation6 + $0x38] sm:$0xff]  ;;  %v1109_v8 = vld [vmem:[#allocation6 + $0x40] sm:$0xff]  ;;  %160 = sbr.rel (%p763_p2) target bundleno = 218 (0xda), region = 40 }
  0x17   : > { %1819 = vst [vmem:[#allocation12_spill] sm:$0xff] %v1107_v7  ;;  %v1111_v9 = vld [vmem:[#allocation6 + $0x48] sm:$0xff]  ;;  %v1113_v10 = vld [vmem:[#allocation6 + $0x50] sm:$0xff]  ;;  %v1115_v11 = vld [vmem:[#allocation6 + $0x58] sm:$0xff] }
  0x18   : > { %1820 = vst [vmem:[#allocation13_spill] sm:$0xff] %v1115_v11  ;;  %v1117_v12 = vld [vmem:[#allocation6 + $0x60] sm:$0xff]  ;;  %v1119_v13 = vld [vmem:[#allocation6 + $0x68] sm:$0xff]  ;;  %v1121_v14 = vld [vmem:[#allocation6 + $0x70] sm:$0xff] }
  0x19   : > { %1821 = vst [vmem:[#allocation14_spill] sm:$0xff] %v1121_v14  ;;  %v1123_v15 = vld [vmem:[#allocation6 + $0x78] sm:$0xff] }
  0x1a   : > { %1822 = vst [vmem:[#allocation15_spill] sm:$0xff] %v1123_v15 }
  0x1b   : > { %775 = vmatpush.msra.mxu2 %v1123_v15  ;;  %776 = vmatpush.msra.mxu3 %v1123_v15  ;;  %v227_v16 = vstv %s161_s23 }
  0x1c   : > { %162 = vmatpush.msra.mxu0 %v1123_v15  ;;  %774 = vmatpush.msra.mxu1 %v1123_v15 }
  0x1d   : > { %778 = vmatpush.msra.mxu2 %v1121_v14  ;;  %779 = vmatpush.msra.mxu3 %v1121_v14 }
  0x1e   : > { %163 = vmatpush.msra.mxu0 %v1121_v14  ;;  %777 = vmatpush.msra.mxu1 %v1121_v14 }
  0x1f   : > { %781 = vmatpush.msra.mxu2 %v1119_v13  ;;  %782 = vmatpush.msra.mxu3 %v1119_v13 }
  0x20   : > { %164 = vmatpush.msra.mxu0 %v1119_v13  ;;  %780 = vmatpush.msra.mxu1 %v1119_v13 }
  0x21   : > { %784 = vmatpush.msra.mxu2 %v1117_v12  ;;  %785 = vmatpush.msra.mxu3 %v1117_v12 }
  0x22   : > { %165 = vmatpush.msra.mxu0 %v1117_v12  ;;  %783 = vmatpush.msra.mxu1 %v1117_v12 }
  0x23   : > { %787 = vmatpush.msra.mxu2 %v1115_v11  ;;  %788 = vmatpush.msra.mxu3 %v1115_v11 }
  0x24   : > { %166 = vmatpush.msra.mxu0 %v1115_v11  ;;  %786 = vmatpush.msra.mxu1 %v1115_v11 }
  0x25   : > { %790 = vmatpush.msra.mxu2 %v1113_v10  ;;  %791 = vmatpush.msra.mxu3 %v1113_v10 }
  0x26   : > { %167 = vmatpush.msra.mxu0 %v1113_v10  ;;  %789 = vmatpush.msra.mxu1 %v1113_v10 }
  0x27   : > { %793 = vmatpush.msra.mxu2 %v1111_v9  ;;  %794 = vmatpush.msra.mxu3 %v1111_v9 }
  0x28   : > { %168 = vmatpush.msra.mxu0 %v1111_v9  ;;  %792 = vmatpush.msra.mxu1 %v1111_v9 }
  0x29   : > { %796 = vmatpush.msra.mxu2 %v1109_v8  ;;  %797 = vmatpush.msra.mxu3 %v1109_v8 }
  0x2a   : > { %169 = vmatpush.msra.mxu0 %v1109_v8  ;;  %795 = vmatpush.msra.mxu1 %v1109_v8 }
  0x2b   : > { %799 = vmatpush.msra.mxu2 %v1107_v7  ;;  %800 = vmatpush.msra.mxu3 %v1107_v7 }
  0x2c   : > { %170 = vmatpush.msra.mxu0 %v1107_v7  ;;  %798 = vmatpush.msra.mxu1 %v1107_v7 }
  0x2d   : > { %802 = vmatpush.msra.mxu2 %v1105_v6  ;;  %803 = vmatpush.msra.mxu3 %v1105_v6 }
  0x2e   : > { %171 = vmatpush.msra.mxu0 %v1105_v6  ;;  %801 = vmatpush.msra.mxu1 %v1105_v6 }
  0x2f   : > { %805 = vmatpush.msra.mxu2 %v1103_v5  ;;  %806 = vmatpush.msra.mxu3 %v1103_v5 }
  0x30   : > { %172 = vmatpush.msra.mxu0 %v1103_v5  ;;  %804 = vmatpush.msra.mxu1 %v1103_v5 }
  0x31   : > { %808 = vmatpush.msra.mxu2 %v1101_v4  ;;  %809 = vmatpush.msra.mxu3 %v1101_v4 }
  0x32   : > { %173 = vmatpush.msra.mxu0 %v1101_v4  ;;  %807 = vmatpush.msra.mxu1 %v1101_v4 }
  0x33   : > { %811 = vmatpush.msra.mxu2 %v1099_v3  ;;  %812 = vmatpush.msra.mxu3 %v1099_v3 }
  0x34   : > { %174 = vmatpush.msra.mxu0 %v1099_v3  ;;  %810 = vmatpush.msra.mxu1 %v1099_v3 }
  0x35   : > { %814 = vmatpush.msra.mxu2 %v1097_v2  ;;  %815 = vmatpush.msra.mxu3 %v1097_v2 }
  0x36   : > { %175 = vmatpush.msra.mxu0 %v1097_v2  ;;  %813 = vmatpush.msra.mxu1 %v1097_v2 }
  0x37   : > { %817 = vmatpush.msra.mxu2 %v1095_v1  ;;  %818 = vmatpush.msra.mxu3 %v1095_v1 }
  0x38   : > { %176 = vmatpush.msra.mxu0 %v1095_v1  ;;  %816 = vmatpush.msra.mxu1 %v1095_v1 }
  0x39   : > { %820 = vmatpush.msra.mxu2 %v1093_v0  ;;  %821 = vmatpush.msra.mxu3 %v1093_v0 }
  0x3a   : > { %202 = vmatmul.f32.vlgmr.msra.gmra.mxu2 %v1109_v8  ;;  %214 = vmatmul.f32.vlgmr.msra.gmra.mxu3 %v1117_v12 }
  0x3b   : > { %177 = vmatpush.msra.mxu0 %v1093_v0  ;;  %819 = vmatpush.msra.mxu1 %v1093_v0 }
  0x3c   : > { %178 = vmatmul.f32.vlgmr.msra.gmra.mxu0 %v1093_v0  ;;  %190 = vmatmul.f32.vlgmr.msra.gmra.mxu1 %v1101_v4 }
  0x42   : > { %205 = vmatmul.f32.gmra.mxu2 %v1111_v9  ;;  %217 = vmatmul.f32.gmra.mxu3 %v1119_v13 }
  0x44   : > { %181 = vmatmul.f32.gmra.mxu0 %v1095_v1  ;;  %193 = vmatmul.f32.gmra.mxu1 %v1103_v5 }
  0x4a   : > { %208 = vmatmul.f32.gmra.mxu2 %v1113_v10  ;;  %220 = vmatmul.f32.gmra.mxu3 %v1121_v14 }
  0x4c   : > { %184 = vmatmul.f32.gmra.mxu0 %v1097_v2  ;;  %196 = vmatmul.f32.gmra.mxu1 %v1105_v6 }
  0x52   : > { %211 = vmatmul.f32.gmra.mxu2 %v1115_v11  ;;  %223 = vmatmul.f32.gmra.mxu3 %v1123_v15 }
  0x54   : > { %187 = vmatmul.f32.gmra.mxu0 %v1099_v3  ;;  %199 = vmatmul.f32.gmra.mxu1 %v1107_v7 }
  0xb9   : > { %v179_v17 = vpop.f32.mrf.mxu0  ;;  %v191_v18 = vpop.f32.mrf.mxu1 }
  0xba   : > { %v228_v19 = vmul.f32 %v227_v16, %v179_v17  ;;  %v232_v20 = vmul.f32 %v227_v16, %v191_v18 }
  0xbc   : > { %244 = vst [vmem:[#allocation7] sm:$0xff] %v228_v19 }
  0xbd   : > { %248 = vst [vmem:[#allocation7 + $0x20] sm:$0xff] %v232_v20  ;;  %v203_v21 = vpop.f32.mrf.mxu2  ;;  %v215_v22 = vpop.f32.mrf.mxu3 }
  0xbe   : > { %v236_v23 = vmul.f32 %v227_v16, %v203_v21  ;;  %v240_v24 = vmul.f32 %v227_v16, %v215_v22 }
  0xc0   : > { %252 = vst [vmem:[#allocation7 + $0x40] sm:$0xff] %v236_v23 }
  0xc1   : > { %256 = vst [vmem:[#allocation7 + $0x60] sm:$0xff] %v240_v24  ;;  %v182_v25 = vpop.f32.mrf.mxu0  ;;  %v194_v26 = vpop.f32.mrf.mxu1 }
  0xc2   : > { %v229_v27 = vmul.f32 %v227_v16, %v182_v25  ;;  %v233_v28 = vmul.f32 %v227_v16, %v194_v26 }
  0xc4   : > { %245 = vst [vmem:[#allocation7 + $0x8] sm:$0xff] %v229_v27 }
  0xc5   : > { %249 = vst [vmem:[#allocation7 + $0x28] sm:$0xff] %v233_v28  ;;  %v206_v29 = vpop.f32.mrf.mxu2  ;;  %v218_v30 = vpop.f32.mrf.mxu3 }
  0xc6   : > { %v237_v31 = vmul.f32 %v227_v16, %v206_v29  ;;  %v241_v32 = vmul.f32 %v227_v16, %v218_v30 }
  0xc8   : > { %253 = vst [vmem:[#allocation7 + $0x48] sm:$0xff] %v237_v31 }
  0xc9   : > { %257 = vst [vmem:[#allocation7 + $0x68] sm:$0xff] %v241_v32  ;;  %v185_v33 = vpop.f32.mrf.mxu0  ;;  %v197_v34 = vpop.f32.mrf.mxu1 }
  0xca   : > { %v230_v35 = vmul.f32 %v227_v16, %v185_v33  ;;  %v234_v36 = vmul.f32 %v227_v16, %v197_v34 }
  0xcc   : > { %246 = vst [vmem:[#allocation7 + $0x10] sm:$0xff] %v230_v35 }
  0xcd   : > { %250 = vst [vmem:[#allocation7 + $0x30] sm:$0xff] %v234_v36  ;;  %v209_v37 = vpop.f32.mrf.mxu2  ;;  %v221_v38 = vpop.f32.mrf.mxu3 }
  0xce   : > { %v238_v39 = vmul.f32 %v227_v16, %v209_v37  ;;  %v242_v40 = vmul.f32 %v227_v16, %v221_v38 }
  0xd0   : > { %254 = vst [vmem:[#allocation7 + $0x50] sm:$0xff] %v238_v39 }
  0xd1   : > { %258 = vst [vmem:[#allocation7 + $0x70] sm:$0xff] %v242_v40  ;;  %v188_v41 = vpop.f32.mrf.mxu0  ;;  %v200_v42 = vpop.f32.mrf.mxu1 }
  0xd2   : > { %v231_v43 = vmul.f32 %v227_v16, %v188_v41  ;;  %v235_v44 = vmul.f32 %v227_v16, %v200_v42 }
  0xd4   : > { %247 = vst [vmem:[#allocation7 + $0x18] sm:$0xff] %v231_v43 }
  0xd5   : > { %251 = vst [vmem:[#allocation7 + $0x38] sm:$0xff] %v235_v44  ;;  %v212_v45 = vpop.f32.mrf.mxu2  ;;  %v224_v46 = vpop.f32.mrf.mxu3 }
  0xd6   : > { %v239_v47 = vmul.f32 %v227_v16, %v212_v45  ;;  %v243_v48 = vmul.f32 %v227_v16, %v224_v46 }
  0xd8   : > { %255 = vst [vmem:[#allocation7 + $0x58] sm:$0xff] %v239_v47 }
  0xd9   : > { %259 = vst [vmem:[#allocation7 + $0x78] sm:$0xff] %v243_v48 }
  0xda PF: > { %p769_p7 = scmp.le.s32.totalorder %s1066_s13, 0 }
  0xdc   : > { %263 = sbr.rel (%p769_p7) target bundleno = 432 (0x1b0), region = 44 }
  0xe1   : > { %602 = vmatpush.msra.mxu0 %v1123_v15  ;;  %822 = vmatpush.msra.mxu1 %v1123_v15  ;;  %v1210_v49 = vld [vmem:[#allocation7] sm:$0xff]  ;;  %v1214_v50 = vld [vmem:[#allocation7 + $0x10] sm:$0xff]  ;;  %v1232_v52 = vld [vmem:[#allocation7 + $0x8] sm:$0xff]  ;;  %s584_s24 = sld [smem:[#allocation2 + %s1066_s13]] }
  0xe2   : > { %823 = vmatpush.msra.mxu2 %v1123_v15  ;;  %824 = vmatpush.msra.mxu3 %v1123_v15  ;;  %v1222_v51 = vld [vmem:[#allocation7 + $0x20] sm:$0xff]  ;;  %v1240_v53 = vld [vmem:[#allocation7 + $0x18] sm:$0xff]  ;;  %v1246_v54 = vld [vmem:[#allocation7 + $0x28] sm:$0xff] }
  0xe3   : > { %280 = vadd.xlane.f32.xlu0 %v1210_v49  ;;  %603 = vmatpush.msra.mxu0 %v1121_v14  ;;  %v270_v55 = vld [vmem:[#allocation7 + $0x30] sm:$0xff]  ;;  %v271_v56 = vld [vmem:[#allocation7 + $0x38] sm:$0xff]  ;;  %v272_v57 = vld [vmem:[#allocation7 + $0x40] sm:$0xff] }
  0xe4   : > { %825 = vmatpush.msra.mxu1 %v1121_v14  ;;  %826 = vmatpush.msra.mxu2 %v1121_v14  ;;  %v273_v58 = vld [vmem:[#allocation7 + $0x48] sm:$0xff]  ;;  %v274_v59 = vld [vmem:[#allocation7 + $0x50] sm:$0xff]  ;;  %v275_v60 = vld [vmem:[#allocation7 + $0x58] sm:$0xff] }
  0xe5   : > { %827 = vmatpush.msra.mxu3 %v1121_v14  ;;  %284 = vadd.xlane.f32.xlu1 %v1214_v50  ;;  %v276_v61 = vld [vmem:[#allocation7 + $0x60] sm:$0xff]  ;;  %v277_v62 = vld [vmem:[#allocation7 + $0x68] sm:$0xff]  ;;  %v278_v63 = vld [vmem:[#allocation7 + $0x70] sm:$0xff] }
  0xe6   : > { %604 = vmatpush.msra.mxu0 %v1119_v13  ;;  %828 = vmatpush.msra.mxu1 %v1119_v13  ;;  %v279_v16 = vld [vmem:[#allocation7 + $0x78] sm:$0xff] }
  0xe7   : > { %829 = vmatpush.msra.mxu2 %v1119_v13  ;;  %830 = vmatpush.msra.mxu3 %v1119_v13  ;;  %v1319_v45 = vstv %s584_s24 }
  0xe8   : > { %288 = vadd.xlane.f32.xlu2 %v1222_v51  ;;  %605 = vmatpush.msra.mxu0 %v1117_v12 }
  0xe9   : > { %831 = vmatpush.msra.mxu1 %v1117_v12  ;;  %832 = vmatpush.msra.mxu2 %v1117_v12 }
  0xea   : > { %833 = vmatpush.msra.mxu3 %v1117_v12  ;;  %606 = vmatpush.msra.mxu0 %v1115_v11 }
  0xeb   : > { %834 = vmatpush.msra.mxu1 %v1115_v11  ;;  %835 = vmatpush.msra.mxu2 %v1115_v11 }
  0xec   : > { %836 = vmatpush.msra.mxu3 %v1115_v11  ;;  %282 = vadd.xlane.f32.xlu0 %v1232_v52 }
  0xed   : > { %607 = vmatpush.msra.mxu0 %v1113_v10  ;;  %837 = vmatpush.msra.mxu1 %v1113_v10 }
  0xee   : > { %838 = vmatpush.msra.mxu2 %v1113_v10  ;;  %839 = vmatpush.msra.mxu3 %v1113_v10 }
  0xef   : > { %286 = vadd.xlane.f32.xlu1 %v1240_v53  ;;  %608 = vmatpush.msra.mxu0 %v1111_v9 }
  0xf0   : > { %840 = vmatpush.msra.mxu1 %v1111_v9  ;;  %841 = vmatpush.msra.mxu2 %v1111_v9 }
  0xf1   : > { %842 = vmatpush.msra.mxu3 %v1111_v9  ;;  %290 = vadd.xlane.f32.xlu2 %v1246_v54 }
  0xf2   : > { %609 = vmatpush.msra.mxu0 %v1109_v8  ;;  %843 = vmatpush.msra.mxu1 %v1109_v8 }
  0xf3   : > { %844 = vmatpush.msra.mxu2 %v1109_v8  ;;  %845 = vmatpush.msra.mxu3 %v1109_v8 }
  0xf4   : > { %610 = vmatpush.msra.mxu0 %v1107_v7  ;;  %846 = vmatpush.msra.mxu1 %v1107_v7 }
  0xf5   : > { %847 = vmatpush.msra.mxu2 %v1107_v7  ;;  %848 = vmatpush.msra.mxu3 %v1107_v7 }
  0xf6   : > { %292 = vadd.xlane.f32.xlu0 %v270_v55  ;;  %611 = vmatpush.msra.mxu0 %v1105_v6 }
  0xf7   : > { %849 = vmatpush.msra.mxu1 %v1105_v6  ;;  %850 = vmatpush.msra.mxu2 %v1105_v6 }
  0xf8   : > { %851 = vmatpush.msra.mxu3 %v1105_v6  ;;  %294 = vadd.xlane.f32.xlu1 %v271_v56 }
  0xf9   : > { %612 = vmatpush.msra.mxu0 %v1103_v5  ;;  %852 = vmatpush.msra.mxu1 %v1103_v5 }
  0xfa   : > { %853 = vmatpush.msra.mxu2 %v1103_v5  ;;  %854 = vmatpush.msra.mxu3 %v1103_v5 }
  0xfb   : > { %296 = vadd.xlane.f32.xlu2 %v272_v57  ;;  %613 = vmatpush.msra.mxu0 %v1101_v4 }
  0xfc   : > { %855 = vmatpush.msra.mxu1 %v1101_v4  ;;  %856 = vmatpush.msra.mxu2 %v1101_v4 }
  0xfd   : > { %857 = vmatpush.msra.mxu3 %v1101_v4  ;;  %614 = vmatpush.msra.mxu0 %v1099_v3 }
  0xfe   : > { %858 = vmatpush.msra.mxu1 %v1099_v3  ;;  %859 = vmatpush.msra.mxu2 %v1099_v3 }
  0xff   : > { %860 = vmatpush.msra.mxu3 %v1099_v3  ;;  %298 = vadd.xlane.f32.xlu0 %v273_v58 }
 0x100   : > { %615 = vmatpush.msra.mxu0 %v1097_v2  ;;  %861 = vmatpush.msra.mxu1 %v1097_v2 }
 0x101   : > { %862 = vmatpush.msra.mxu2 %v1097_v2  ;;  %863 = vmatpush.msra.mxu3 %v1097_v2 }
 0x102   : > { %300 = vadd.xlane.f32.xlu1 %v274_v59  ;;  %616 = vmatpush.msra.mxu0 %v1095_v1 }
 0x103   : > { %864 = vmatpush.msra.mxu1 %v1095_v1  ;;  %865 = vmatpush.msra.mxu2 %v1095_v1 }
 0x104   : > { %866 = vmatpush.msra.mxu3 %v1095_v1  ;;  %302 = vadd.xlane.f32.xlu2 %v275_v60 }
 0x105   : > { %617 = vmatpush.msra.mxu0 %v1093_v0  ;;  %867 = vmatpush.msra.mxu1 %v1093_v0 }
 0x106   : > { %868 = vmatpush.msra.mxu2 %v1093_v0  ;;  %869 = vmatpush.msra.mxu3 %v1093_v0 }
 0x107   : > { %618 = vmatmul.f32.vlgmr.msra.gmra.mxu0 %v1210_v49  ;;  %630 = vmatmul.f32.vlgmr.msra.gmra.mxu1 %v1222_v51 }
 0x108   : > { %642 = vmatmul.f32.vlgmr.msra.gmra.mxu2 %v272_v57  ;;  %654 = vmatmul.f32.vlgmr.msra.gmra.mxu3 %v276_v61 }
 0x109   : > { %304 = vadd.xlane.f32.xlu0 %v276_v61 }
 0x10a   : > { %306 = vadd.xlane.f32.xlu1 %v277_v62 }
 0x10c   : > { %308 = vadd.xlane.f32.xlu2 %v278_v63 }
 0x10f   : > { %621 = vmatmul.f32.gmra.mxu0 %v1232_v52  ;;  %633 = vmatmul.f32.gmra.mxu1 %v1246_v54 }
 0x110   : > { %645 = vmatmul.f32.gmra.mxu2 %v273_v58  ;;  %657 = vmatmul.f32.gmra.mxu3 %v277_v62 }
 0x111   : > { %310 = vadd.xlane.f32.xlu0 %v279_v16 }
 0x117   : > { %624 = vmatmul.f32.gmra.mxu0 %v1214_v50  ;;  %636 = vmatmul.f32.gmra.mxu1 %v270_v55 }
 0x118   : > { %648 = vmatmul.f32.gmra.mxu2 %v274_v59  ;;  %660 = vmatmul.f32.gmra.mxu3 %v278_v63 }
 0x11f   : > { %627 = vmatmul.f32.gmra.mxu0 %v1240_v53  ;;  %639 = vmatmul.f32.gmra.mxu1 %v271_v56 }
 0x120   : > { %651 = vmatmul.f32.gmra.mxu2 %v275_v60  ;;  %663 = vmatmul.f32.gmra.mxu3 %v279_v16 }
 0x156   : > { %v281_v17 = vpop.xlane.xlu0 %280 }
 0x157   : > { %v312_v18 = vadd.f32 1.0, %v281_v17 }
 0x158   : > { %v285_v19 = vpop.xlane.xlu1 %284 }
 0x159   : > { %vm328_vm0 = vcmp.le.f32.partialorder %v312_v18, 1e-10  ;;  %v314_v20 = vadd.f32 1.0, %v285_v19 }
 0x15a   : > { %v344_v21 = vsel %vm328_vm0, 1.0, %v312_v18 }
 0x15b   : > { %910 = vrcp.f32 %v344_v21  ;;  %vm330_vm1 = vcmp.le.f32.partialorder %v314_v20, 1e-10  ;;  %v289_v22 = vpop.xlane.xlu2 %288  ;;  %v371_v34 = vand.u32 2147483648, %v344_v21  ;;  %v369_v38 = vand.u32 2147483647, %v344_v21 }
 0x15c   : > { %v1296_v23 = vsel %vm330_vm1, 1.0, %v314_v20  ;;  %v316_v24 = vadd.f32 1.0, %v289_v22  ;;  %vm365_vm5 = vweird.f32 %v344_v21 }
 0x15d   : > { %912 = vrcp.f32 %v1296_v23  ;;  %v399_v42 = vand.u32 2147483648, %v1296_v23  ;;  %v372_v44 = vor.u32 1.1754944e-38, %v371_v34  ;;  %vm1326_vm7 = vcmp.eq.f32.partialorder %v369_v38, 8.507059e+37 }
 0x15e   : > { %vm332_vm2 = vcmp.le.f32.partialorder %v316_v24, 1e-10 }
 0x15f   : > { %v1299_v25 = vsel %vm332_vm2, 1.0, %v316_v24  ;;  %v283_v26 = vpop.xlane.xlu0 %282  ;;  %v1336_v55 = vor.u32 1.1754944e-38, %v399_v42 }
 0x160   : > { %914 = vrcp.f32 %v1299_v25  ;;  %v313_v27 = vadd.f32 1.0, %v283_v26  ;;  %v427_v52 = vand.u32 2147483648, %v1299_v25  ;;  %v425_v54 = vand.u32 2147483647, %v1299_v25 }
 0x161   : > { %v1303_v28 = vpop.eup %910  ;;  %vm421_vm10 = vweird.f32 %v1299_v25 }
 0x162   : > { %v361_v29 = vmul.f32 %v1303_v28, %v344_v21  ;;  %vm329_vm3 = vcmp.le.f32.partialorder %v313_v27, 1e-10  ;;  %v287_v30 = vpop.xlane.xlu1 %286  ;;  %vm366_vm8 = vweird.f32 %v1303_v28  ;;  %v428_v18 = vor.u32 1.1754944e-38, %v427_v52 }
 0x163   : > { %v1306_v31 = vsel %vm329_vm3, 1.0, %v313_v27  ;;  %v315_v32 = vadd.f32 1.0, %v287_v30  ;;  %v1309_v36 = vpop.eup %912  ;;  %vm1347_vm11 = vmor %vm365_vm5, %vm366_vm8  ;;  %vm1353_vm13 = vcmp.eq.f32.partialorder %v425_v54, 8.507059e+37 }
 0x164   : > { %v362_v33 = vsub.f32 1.0, %v361_v29  ;;  %916 = vrcp.f32 %v1306_v31  ;;  %v291_v35 = vpop.xlane.xlu2 %290  ;;  %v389_v46 = vmul.f32 %v1309_v36, %v1296_v23  ;;  %v385_v60 = vand.u32 2147483648, %v1306_v31 }
 0x165   : > { %vm331_vm4 = vcmp.le.f32.partialorder %v315_v32, 1e-10  ;;  %v317_v37 = vadd.f32 1.0, %v291_v35  ;;  %vm379_vm14 = vweird.f32 %v1306_v31 }
 0x166   : > { %v1311_v39 = vpop.eup %914  ;;  %v1313_v40 = vsel %vm331_vm4, 1.0, %v315_v32  ;;  %v363_v41 = vmul.f32 %v1303_v28, %v362_v33  ;;  %v390_v62 = vsub.f32 1.0, %v389_v46  ;;  %v386_v27 = vor.u32 1.1754944e-38, %v385_v60 }
 0x167   : > { %v417_v43 = vmul.f32 %v1311_v39, %v1299_v25  ;;  %vm333_vm6 = vcmp.le.f32.partialorder %v317_v37, 1e-10  ;;  %918 = vrcp.f32 %v1313_v40  ;;  %vm422_vm12 = vweird.f32 %v1311_v39 }
 0x168   : > { %v1324_v48 = vsel %vm333_vm6, 1.0, %v317_v37  ;;  %v364_v58 = vadd.f32 %v1303_v28, %v363_v41  ;;  %v383_v32 = vand.u32 2147483647, %v1306_v31  ;;  %v1370_v33 = vmul.f32 %v1309_v36, %v390_v62  ;;  %vm1376_vm0 = vmor %vm421_vm10, %vm422_vm12 }
 0x169   : > { %v418_v47 = vsub.f32 1.0, %v417_v43  ;;  %v293_v49 = vpop.xlane.xlu0 %292  ;;  %920 = vrcp.f32 %v1324_v48  ;;  %v441_v35 = vand.u32 2147483648, %v1324_v48  ;;  %vm435_vm4 = vweird.f32 %v1324_v48 }
 0x16a   : > { %v1330_v51 = vpop.eup %916  ;;  %v318_v53 = vadd.f32 1.0, %v293_v49  ;;  %v368_v24 = vsel %vm1347_vm11, %v1303_v28, %v364_v58  ;;  %vm1400_vm3 = vcmp.eq.f32.partialorder %v383_v32, 8.507059e+37 }
 0x16b   : > { %v375_v56 = vmul.f32 %v1330_v51, %v1306_v31  ;;  %v295_v57 = vpop.xlane.xlu1 %294  ;;  %v419_v59 = vmul.f32 %v1311_v39, %v418_v47  ;;  %v373_v25 = vsel %vm1326_vm7, %v372_v44, %v368_v24  ;;  %vm380_vm2 = vweird.f32 %v1330_v51 }
 0x16c   : > { %vm334_vm9 = vcmp.le.f32.partialorder %v318_v53, 1e-10  ;;  %v319_v61 = vadd.f32 1.0, %v295_v57  ;;  %v1405_v50 = vor.u32 1.1754944e-38, %v441_v35  ;;  %vm1426_vm6 = vmor %vm379_vm14, %vm380_vm2 }
 0x16d   : > { %v376_v63 = vsub.f32 1.0, %v375_v56  ;;  %v1344_v16 = vsel %vm334_vm9, 1.0, %v318_v53  ;;  %v1357_v22 = vpop.eup %918  ;;  %v420_v30 = vadd.f32 %v1311_v39, %v419_v59 }
 0x16e   : > { %922 = vrcp.f32 %v1344_v16  ;;  %v297_v19 = vpop.xlane.xlu2 %296  ;;  %vm335_vm15 = vcmp.le.f32.partialorder %v319_v61, 1e-10  ;;  %v403_v37 = vmul.f32 %v1357_v22, %v1313_v40  ;;  %v455_v43 = vand.u32 2147483648, %v1344_v16 }
 0x16f   : > { %v320_v21 = vadd.f32 1.0, %v297_v19  ;;  %v1363_v26 = vpop.eup %920  ;;  %v1365_v29 = vsel %vm335_vm15, 1.0, %v319_v61  ;;  %v377_v28 = vmul.f32 %v1330_v51, %v376_v63  ;;  %v424_v52 = vsel %vm1376_vm0, %v1311_v39, %v420_v30 }
 0x170   : > { %924 = vrcp.f32 %v1365_v29  ;;  %v431_v42 = vmul.f32 %v1363_v26, %v1324_v48  ;;  %v404_v57 = vsub.f32 1.0, %v403_v37  ;;  %v1413_v39 = vmul.f32 %v1319_v45, %v373_v25 }
 0x171   : > { %vm336_vm1 = vcmp.le.f32.partialorder %v320_v21, 1e-10  ;;  %v378_v56 = vadd.f32 %v1330_v51, %v377_v28  ;;  %v1417_v62 = vor.u32 1.1754944e-38, %v455_v43  ;;  %v429_v17 = vsel %vm1353_vm13, %v428_v18, %v424_v52 }
 0x172   : > { %v299_v41 = vpop.xlane.xlu0 %298  ;;  %v1391_v46 = vsel %vm336_vm1, 1.0, %v320_v21  ;;  %v432_v61 = vsub.f32 1.0, %v431_v42  ;;  %vm436_vm7 = vweird.f32 %v1363_v26  ;;  %v1442_v34 = vmul.f32 %v1357_v22, %v404_v57 }
 0x173   : > { %v321_v47 = vadd.f32 1.0, %v299_v41  ;;  %926 = vrcp.f32 %v1391_v46  ;;  %v483_v32 = vand.u32 2147483648, %v1391_v46  ;;  %v382_v31 = vsel %vm1426_vm6, %v1330_v51, %v378_v56  ;;  %vm1485_vm12 = vmor %vm435_vm4, %vm436_vm7 }
 0x174   : > { %v1393_v49 = vpop.eup %922  ;;  %v1447_v35 = vmul.f32 %v1319_v45, %v429_v17  ;;  %v433_v37 = vmul.f32 %v1363_v26, %v432_v61  ;;  %v387_v52 = vsel %vm1400_vm3, %v386_v27, %v382_v31  ;;  %vm477_vm10 = vweird.f32 %v1391_v46 }
 0x175   : > { %v445_v53 = vmul.f32 %v1393_v49, %v1344_v16  ;;  %vm337_vm5 = vcmp.le.f32.partialorder %v321_v47, 1e-10  ;;  %v301_v54 = vpop.xlane.xlu1 %300  ;;  %v1464_v56 = vor.u32 1.1754944e-38, %v483_v32  ;;  %vm393_vm7 = vweird.f32 %v1296_v23 }
 0x176   : > { %v1410_v58 = vsel %vm337_vm5, 1.0, %v321_v47  ;;  %v322_v59 = vadd.f32 1.0, %v301_v54  ;;  %v1415_v60 = vpop.eup %924  ;;  %v481_v47 = vand.u32 2147483647, %v1391_v46 }
 0x177   : > { %1833 = vst [vmem:[#allocation16_spill] sm:$0xff] %v1415_v60  ;;  %928 = vrcp.f32 %v1410_v58  ;;  %v303_v63 = vpop.xlane.xlu2 %302  ;;  %v459_v21 = vmul.f32 %v1415_v60, %v1365_v29  ;;  %v446_v30 = vsub.f32 1.0, %v445_v53  ;;  %v497_v25 = vand.u32 2147483648, %v1410_v58 }
 0x178   : > { %vm338_vm8 = vcmp.le.f32.partialorder %v322_v59, 1e-10  ;;  %v323_v24 = vadd.f32 1.0, %v303_v63  ;;  %vm1500_vm15 = vcmp.eq.f32.partialorder %v481_v47, 8.507059e+37  ;;  %vm491_vm5 = vweird.f32 %v1410_v58 }
 0x179   : > { %v1434_v20 = vsel %vm338_vm8, 1.0, %v322_v59  ;;  %v1439_v18 = vpop.eup %926  ;;  %v460_v51 = vsub.f32 1.0, %v459_v21  ;;  %v1461_v54 = vmul.f32 %v1393_v49, %v446_v30  ;;  %v1471_v17 = vor.u32 1.1754944e-38, %v497_v25 }
 0x17a   : > { %930 = vrcp.f32 %v1434_v20  ;;  %v473_v41 = vmul.f32 %v1439_v18, %v1391_v46  ;;  %vm339_vm9 = vcmp.le.f32.partialorder %v323_v24, 1e-10  ;;  %v511_v57 = vand.u32 2147483648, %v1434_v20 }
 0x17b   : > { %v1453_v42 = vsel %vm339_vm9, 1.0, %v323_v24  ;;  %vm478_vm11 = vweird.f32 %v1439_v18  ;;  %v1474_v21 = vmul.f32 %v1319_v45, %v387_v52  ;;  %v1477_v24 = vadd.f32 %v1363_v26, %v433_v37 }
 0x17c   : > { %v305_v43 = vpop.xlane.xlu0 %304  ;;  %932 = vrcp.f32 %v1453_v42  ;;  %v474_v61 = vsub.f32 1.0, %v473_v41  ;;  %v1490_v31 = vmul.f32 %v1415_v60, %v460_v51  ;;  %v1494_v25 = vor.u32 1.1754944e-38, %v511_v57  ;;  %vm1539_vm4 = vmor %vm477_vm10, %vm478_vm11 }
 0x17d   : > { %v1458_v53 = vpop.eup %928  ;;  %v307_v59 = vpop.xlane.xlu1 %306  ;;  %v324_v44 = vadd.f32 1.0, %v305_v43  ;;  %vm394_vm8 = vweird.f32 %v1309_v36  ;;  %vm505_vm10 = vweird.f32 %v1434_v20 }
 0x17e   : > { %v487_v63 = vmul.f32 %v1458_v53, %v1410_v58  ;;  %v325_v27 = vadd.f32 1.0, %v307_v59  ;;  %1838 = vst [vmem:[#allocation17_spill] sm:$0xff] %v1490_v31  ;;  %v475_v28 = vmul.f32 %v1439_v18, %v474_v61  ;;  %vm492_vm6 = vweird.f32 %v1458_v53 }
 0x17f   : > { %v309_v19 = vpop.xlane.xlu2 %308  ;;  %vm340_vm13 = vcmp.le.f32.partialorder %v324_v44, 1e-10  ;;  %1839 = vst [vmem:[#allocation18_spill] sm:$0xff] %v1494_v25 }
 0x180   : > { %v1479_v30 = vpop.eup %930  ;;  %vm341_vm14 = vcmp.le.f32.partialorder %v325_v27, 1e-10  ;;  %v326_v41 = vadd.f32 1.0, %v309_v19  ;;  %v1496_v43 = vsel %vm340_vm13, 1.0, %v324_v44  ;;  %v488_v51 = vsub.f32 1.0, %v487_v63 }
 0x181   : > { %v501_v37 = vmul.f32 %v1479_v30, %v1434_v20  ;;  %v1498_v52 = vsel %vm341_vm14, 1.0, %v325_v27  ;;  %934 = vrcp.f32 %v1496_v43  ;;  %v539_v57 = vand.u32 2147483648, %v1496_v43 }
 0x182   : > { %v1507_v19 = vpop.eup %932  ;;  %936 = vrcp.f32 %v1498_v52  ;;  %vm342_vm0 = vcmp.le.f32.partialorder %v326_v41, 1e-10  ;;  %v553_v11 = vand.u32 2147483648, %v1498_v52  ;;  %v1524_v47 = vmul.f32 %v1458_v53, %v488_v51 }
 0x183   : > { %1842 = vst [vmem:[#allocation19_spill] sm:$0xff] %v1507_v19  ;;  %v502_v27 = vsub.f32 1.0, %v501_v37  ;;  %v515_v61 = vmul.f32 %v1507_v19, %v1453_v42  ;;  %v1520_v7 = vsel %vm342_vm0, 1.0, %v326_v41  ;;  %vm533_vm1 = vweird.f32 %v1496_v43 }
 0x184   : > { %v631_v63 = vpop.f32.mrf.mxu1  ;;  %v311_v38 = vpop.xlane.xlu0 %310  ;;  %938 = vrcp.f32 %v1520_v7  ;;  %v1528_v44 = vor.u32 1.1754944e-38, %v539_v57  ;;  %vm547_vm2 = vweird.f32 %v1498_v52  ;;  %v567_v51 = vand.u32 2147483648, %v1520_v7 }
 0x185   : > { %v632_v60 = vadd.f32 %v631_v63, %v1101_v4  ;;  %v327_v31 = vadd.f32 1.0, %v311_v38  ;;  %v619_v3 = vpop.f32.mrf.mxu0  ;;  %v516_v37 = vsub.f32 1.0, %v515_v61  ;;  %v1555_v46 = vmul.f32 %v1479_v30, %v502_v27 }
 0x186   : > { %v1559_v15 = vor.u32 1.1754944e-38, %v553_v11  ;;  %v537_v25 = vand.u32 2147483647, %v1496_v43  ;;  %vm506_vm11 = vweird.f32 %v1479_v30 }
 0x187   : > { %v671_v41 = vmul.f32 %v632_v60, %v1447_v35  ;;  %vm343_vm3 = vcmp.le.f32.partialorder %v327_v31, 1e-10  ;;  %v1533_v4 = vpop.eup %934  ;;  %v620_v60 = vadd.f32 %v619_v3, %v1093_v0  ;;  %v476_v35 = vadd.f32 %v1439_v18, %v475_v28 }
 0x188   : > { %v1546_v57 = vsel %vm343_vm3, 1.0, %v327_v31  ;;  %v1550_v61 = vpop.eup %936  ;;  %v529_v63 = vmul.f32 %v1533_v4, %v1496_v43  ;;  %v1563_v0 = vmul.f32 %v1507_v19, %v516_v37  ;;  %vm534_vm9 = vweird.f32 %v1533_v4 }
 0x189   : > { %687 = vst [vmem:[#allocation7 + $0x20] sm:$0xff] %v671_v41  ;;  %940 = vrcp.f32 %v1546_v57  ;;  %v543_v3 = vmul.f32 %v1550_v61, %v1498_v52  ;;  %v565_v28 = vand.u32 2147483647, %v1520_v7  ;;  %v667_v27 = vmul.f32 %v620_v60, %v1413_v39  ;;  %vm535_vm14 = vmor %vm533_vm1, %vm534_vm9 }
 0x18a   : > { %1845 = vst [vmem:[#allocation20_spill] sm:$0xff] %v1563_v0  ;;  %v530_v31 = vsub.f32 1.0, %v529_v63  ;;  %v480_v11 = vsel %vm1539_vm4, %v1439_v18, %v476_v35  ;;  %v1574_v37 = vpop.eup %938  ;;  %v1578_v0 = vor.u32 1.1754944e-38, %v567_v51  ;;  %vm548_vm0 = vweird.f32 %v1550_v61  ;;  %vm1649_vm9 = vmor %vm491_vm5, %vm492_vm6 }
 0x18b   : > { %v643_v41 = vpop.f32.mrf.mxu2  ;;  %v655_v14 = vpop.f32.mrf.mxu3  ;;  %v544_v19 = vsub.f32 1.0, %v543_v3  ;;  %v485_v39 = vsel %vm1500_vm15, %v1464_v56, %v480_v11  ;;  %v557_v35 = vmul.f32 %v1574_v37, %v1520_v7  ;;  %683 = vst [vmem:[#allocation7] sm:$0xff] %v667_v27  ;;  %vm1593_vm15 = vcmp.eq.f32.partialorder %v537_v25, 8.507059e+37  ;;  %vm1629_vm1 = vmor %vm547_vm2, %vm548_vm0 }
 0x18c   : > { %v644_v38 = vadd.f32 %v643_v41, %v1109_v8  ;;  %v634_v18 = vpop.f32.mrf.mxu1  ;;  %v531_v60 = vmul.f32 %v1533_v4, %v530_v31  ;;  %v594_v51 = vmul.f32 %v1319_v45, %v485_v39  ;;  %v581_v8 = vand.u32 2147483648, %v1546_v57  ;;  %vm1665_vm5 = vmor %vm393_vm7, %vm394_vm8 }
 0x18d   : > { %v622_v63 = vpop.f32.mrf.mxu0  ;;  %v545_v56 = vmul.f32 %v1550_v61, %v544_v19  ;;  %v558_v11 = vsub.f32 1.0, %v557_v35  ;;  %vm561_vm3 = vweird.f32 %v1520_v7  ;;  %vm562_vm4 = vweird.f32 %v1574_v37  ;;  %vm1696_vm7 = vmor %vm505_vm10, %vm506_vm11 }
 0x18e   : > { %v623_v3 = vadd.f32 %v622_v63, %v1095_v1  ;;  %v675_v27 = vmul.f32 %v644_v38, %v594_v51  ;;  %v532_v41 = vadd.f32 %v1533_v4, %v531_v60  ;;  %v1848_v19 = vand.u32 2147483647, %v1324_v48 }
 0x18f   : > { %v1598_v31 = vpop.eup %940  ;;  %v656_v25 = vadd.f32 %v655_v14, %v1117_v12  ;;  %v1849_v38 = vsel %vm1485_vm12, %v1363_v26, %v1477_v24  ;;  %v1620_v60 = vmul.f32 %v1574_v37, %v558_v11  ;;  %v635_v51 = vadd.f32 %v634_v18, %v1103_v5  ;;  %v1870_v5 = vld [vmem:[#allocation14_spill] sm:$0xff] }
 0x190   : > { %vm440_vm13 = vcmp.eq.f32.partialorder %v1848_v19, 8.507059e+37  ;;  %v571_v1 = vmul.f32 %v1598_v31, %v1546_v57  ;;  %v668_v39 = vmul.f32 %v623_v3, %v1474_v21  ;;  %691 = vst [vmem:[#allocation7 + $0x40] sm:$0xff] %v675_v27  ;;  %v536_v43 = vsel %vm535_vm14, %v1533_v4, %v532_v41 }
 0x191   : > { %v443_v48 = vsel %vm440_vm13, %v1405_v50, %v1849_v38  ;;  %v541_v26 = vsel %vm1593_vm15, %v1528_v44, %v536_v43  ;;  %v490_v50 = vadd.f32 %v1458_v53, %v1524_v47  ;;  %v1852_v21 = vand.u32 2147483647, %v1410_v58 }
 0x192   : > { %v591_v35 = vmul.f32 %v1319_v45, %v443_v48  ;;  %v572_v14 = vsub.f32 1.0, %v571_v1  ;;  %684 = vst [vmem:[#allocation7 + $0x8] sm:$0xff] %v668_v39  ;;  %vm407_vm2 = vweird.f32 %v1313_v40  ;;  %v598_v32 = vmul.f32 %v1319_v45, %v541_v26 }
 0x193   : > { %vm1640_vm12 = vcmp.eq.f32.partialorder %v1852_v21, 8.507059e+37  ;;  %v646_v47 = vpop.f32.mrf.mxu2  ;;  %v546_v4 = vadd.f32 %v1550_v61, %v545_v56  ;;  %v1857_v18 = vand.u32 2147483647, %v1498_v52  ;;  %v658_v59 = vpop.f32.mrf.mxu3  ;;  %v494_v52 = vsel %vm1649_vm9, %v1458_v53, %v490_v50 }
 0x194   : > { %v672_v44 = vmul.f32 %v635_v51, %v591_v35  ;;  %v1670_v3 = vmul.f32 %v1598_v31, %v572_v14  ;;  %v647_v56 = vadd.f32 %v646_v47, %v1111_v9  ;;  %v659_v11 = vadd.f32 %v658_v59, %v1119_v13  ;;  %v637_v27 = vpop.f32.mrf.mxu1  ;;  %v1873_v59 = vld [vmem:[#allocation11_spill] sm:$0xff] }
 0x195   : > { %vm1657_vm13 = vcmp.eq.f32.partialorder %v1857_v18, 8.507059e+37  ;;  %v679_v41 = vmul.f32 %v656_v25, %v598_v32  ;;  %v499_v19 = vsel %vm1640_vm12, %v1471_v17, %v494_v52  ;;  %v550_v1 = vsel %vm1629_vm1, %v1550_v61, %v546_v4  ;;  %v625_v38 = vpop.f32.mrf.mxu0  ;;  %vm1727_vm1 = vmor %vm561_vm3, %vm562_vm4  ;;  %v1871_v32 = vld [vmem:[#allocation18_spill] sm:$0xff]  ;;  %v1874_v52 = vld [vmem:[#allocation17_spill] sm:$0xff] }
 0x196   : > { %688 = vst [vmem:[#allocation7 + $0x28] sm:$0xff] %v672_v44  ;;  %v392_v39 = vadd.f32 %v1309_v36, %v1370_v33  ;;  %vm463_vm6 = vweird.f32 %v1365_v29  ;;  %v595_v9 = vmul.f32 %v1319_v45, %v499_v19  ;;  %v555_v13 = vsel %vm1657_vm13, %v1559_v15, %v550_v1 }
 0x197   : > { %v397_v53 = vand.u32 2147483647, %v1296_v23  ;;  %v626_v17 = vadd.f32 %v625_v38, %v1097_v2  ;;  %695 = vst [vmem:[#allocation7 + $0x60] sm:$0xff] %v679_v41  ;;  %v599_v33 = vmul.f32 %v1319_v45, %v555_v13  ;;  %v448_v15 = vadd.f32 %v1393_v49, %v1461_v54  ;;  %v1878_v13 = vld [vmem:[#allocation20_spill] sm:$0xff] }
 0x198   : > { %v396_v25 = vsel %vm1665_vm5, %v1309_v36, %v392_v39  ;;  %v453_v2 = vand.u32 2147483647, %v1344_v16  ;;  %vm1864_vm8 = vweird.f32 %v1393_v49  ;;  %vm1865_vm14 = vweird.f32 %v1344_v16 }
 0x199   : > { %vm1711_vm10 = vmor %vm1865_vm14, %vm1864_vm8  ;;  %v676_v48 = vmul.f32 %v647_v56, %v595_v9  ;;  %vm398_vm11 = vcmp.eq.f32.partialorder %v397_v53, 8.507059e+37  ;;  %v638_v43 = vadd.f32 %v637_v27, %v1105_v6  ;;  %v504_v36 = vadd.f32 %v1479_v30, %v1555_v46  ;;  %v1875_v56 = vld [vmem:[#allocation16_spill] sm:$0xff]  ;;  %v1879_v53 = vld [vmem:[#allocation19_spill] sm:$0xff] }
 0x19a   : > { %vm519_vm0 = vweird.f32 %v1453_v42  ;;  %v680_v54 = vmul.f32 %v659_v11, %v599_v33  ;;  %v401_v35 = vsel %vm398_vm11, %v1336_v55, %v396_v25  ;;  %v452_v16 = vsel %vm1711_vm10, %v1393_v49, %v448_v15 }
 0x19b   : > { %vm454_vm15 = vcmp.eq.f32.partialorder %v453_v2, 8.507059e+37  ;;  %vm575_vm12 = vweird.f32 %v1546_v57  ;;  %vm576_vm9 = vweird.f32 %v1598_v31  ;;  %692 = vst [vmem:[#allocation7 + $0x48] sm:$0xff] %v676_v48  ;;  %v588_v6 = vmul.f32 %v1319_v45, %v401_v35  ;;  %v649_v14 = vpop.f32.mrf.mxu2  ;;  %v661_v50 = vpop.f32.mrf.mxu3 }
 0x19c   : > { %v457_v55 = vsel %vm454_vm15, %v1417_v62, %v452_v16  ;;  %v508_v49 = vsel %vm1696_vm7, %v1479_v30, %v504_v36  ;;  %v509_v46 = vand.u32 2147483647, %v1434_v20  ;;  %696 = vst [vmem:[#allocation7 + $0x68] sm:$0xff] %v680_v54  ;;  %v560_v26 = vadd.f32 %v1574_v37, %v1620_v60  ;;  %v640_v18 = vpop.f32.mrf.mxu1  ;;  %vm577_vm11 = vmor %vm575_vm12, %vm576_vm9  ;;  %v1881_v54 = vld [vmem:[#allocation13_spill] sm:$0xff] }
 0x19d   : > { %v592_v12 = vmul.f32 %v1319_v45, %v457_v55  ;;  %vm566_vm3 = vcmp.eq.f32.partialorder %v565_v28, 8.507059e+37  ;;  %v406_v62 = vadd.f32 %v1357_v22, %v1442_v34  ;;  %v669_v21 = vmul.f32 %v626_v17, %v588_v6  ;;  %v628_v7 = vpop.f32.mrf.mxu0 }
 0x19e   : > { %vm510_vm4 = vcmp.eq.f32.partialorder %v509_v46, 8.507059e+37  ;;  %v650_v30 = vadd.f32 %v649_v14, %v1113_v10  ;;  %v662_v20 = vadd.f32 %v661_v50, %v1870_v5  ;;  %v564_v60 = vsel %vm1727_vm1, %v1574_v37, %v560_v26 }
 0x19f   : > { %v673_v24 = vmul.f32 %v638_v43, %v592_v12  ;;  %v513_v44 = vsel %vm510_vm4, %v1871_v32, %v508_v49  ;;  %vm408_vm13 = vweird.f32 %v1357_v22  ;;  %685 = vst [vmem:[#allocation7 + $0x10] sm:$0xff] %v669_v21  ;;  %v569_v34 = vsel %vm566_vm3, %v1578_v0, %v564_v60  ;;  %v1882_v49 = vld [vmem:[#allocation15_spill] sm:$0xff] }
 0x1a0   : > { %v596_v28 = vmul.f32 %v1319_v45, %v513_v44  ;;  %vm409_vm5 = vmor %vm407_vm2, %vm408_vm13  ;;  %v411_v10 = vand.u32 2147483647, %v1313_v40  ;;  %v1872_v47 = vand.u32 2147483648, %v1313_v40  ;;  %v600_v37 = vmul.f32 %v1319_v45, %v569_v34 }
 0x1a1   : > { %689 = vst [vmem:[#allocation7 + $0x30] sm:$0xff] %v673_v24  ;;  %v410_v63 = vsel %vm409_vm5, %v1357_v22, %v406_v62  ;;  %v629_v58 = vadd.f32 %v628_v7, %v1873_v59  ;;  %v462_v11 = vadd.f32 %v1875_v56, %v1874_v52  ;;  %vm464_vm2 = vweird.f32 %v1875_v56  ;;  %v1877_v22 = vld [vmem:[#allocation12_spill] sm:$0xff] }
 0x1a2   : > { %v414_v4 = vor.u32 1.1754944e-38, %v1872_v47  ;;  %v677_v0 = vmul.f32 %v650_v30, %v596_v28  ;;  %vm412_vm7 = vcmp.eq.f32.partialorder %v411_v10, 8.507059e+37  ;;  %v467_v27 = vand.u32 2147483647, %v1365_v29  ;;  %vm465_vm8 = vmor %vm463_vm6, %vm464_vm2 }
 0x1a3   : > { %v681_v41 = vmul.f32 %v662_v20, %v600_v37  ;;  %v1876_v19 = vand.u32 2147483648, %v1365_v29  ;;  %v641_v39 = vadd.f32 %v640_v18, %v1877_v22  ;;  %v466_v9 = vsel %vm465_vm8, %v1875_v56, %v462_v11  ;;  %v652_v15 = vpop.f32.mrf.mxu2  ;;  %v664_v43 = vpop.f32.mrf.mxu3 }
 0x1a4   : > { %v415_v40 = vsel %vm412_vm7, %v414_v4, %v410_v63  ;;  %693 = vst [vmem:[#allocation7 + $0x50] sm:$0xff] %v677_v0  ;;  %vm468_vm14 = vcmp.eq.f32.partialorder %v467_v27, 8.507059e+37  ;;  %v518_v17 = vadd.f32 %v1879_v53, %v1878_v13  ;;  %vm520_vm10 = vweird.f32 %v1879_v53 }
 0x1a5   : > { %v470_v1 = vor.u32 1.1754944e-38, %v1876_v19  ;;  %v589_v38 = vmul.f32 %v1319_v45, %v415_v40  ;;  %697 = vst [vmem:[#allocation7 + $0x70] sm:$0xff] %v681_v41  ;;  %v523_v33 = vand.u32 2147483647, %v1453_v42  ;;  %v1880_v29 = vand.u32 2147483648, %v1453_v42  ;;  %vm521_vm6 = vmor %vm519_vm0, %vm520_vm10 }
 0x1a6   : > { %v574_v48 = vadd.f32 %v1598_v31, %v1670_v3  ;;  %v522_v36 = vsel %vm521_vm6, %v1879_v53, %v518_v17  ;;  %v653_v35 = vadd.f32 %v652_v15, %v1881_v54  ;;  %v579_v16 = vand.u32 2147483647, %v1546_v57 }
 0x1a7   : > { %v471_v61 = vsel %vm468_vm14, %v470_v1, %v466_v9  ;;  %v526_v25 = vor.u32 1.1754944e-38, %v1880_v29  ;;  %v670_v2 = vmul.f32 %v629_v58, %v589_v38  ;;  %vm524_vm15 = vcmp.eq.f32.partialorder %v523_v33, 8.507059e+37 }
 0x1a8   : > { %v593_v23 = vmul.f32 %v1319_v45, %v471_v61  ;;  %v582_v42 = vor.u32 1.1754944e-38, %v581_v8  ;;  %v578_v3 = vsel %vm577_vm11, %v1598_v31, %v574_v48  ;;  %vm580_vm0 = vcmp.eq.f32.partialorder %v579_v16, 8.507059e+37 }
 0x1a9   : > { %686 = vst [vmem:[#allocation7 + $0x18] sm:$0xff] %v670_v2  ;;  %v527_v6 = vsel %vm524_vm15, %v526_v25, %v522_v36  ;;  %v665_v46 = vadd.f32 %v664_v43, %v1882_v49 }
 0x1aa   : > { %v674_v51 = vmul.f32 %v641_v39, %v593_v23  ;;  %v597_v55 = vmul.f32 %v1319_v45, %v527_v6  ;;  %v583_v12 = vsel %vm580_vm0, %v582_v42, %v578_v3 }
 0x1ab   : > { %v601_v26 = vmul.f32 %v1319_v45, %v583_v12 }
 0x1ac   : > { %690 = vst [vmem:[#allocation7 + $0x38] sm:$0xff] %v674_v51  ;;  %v678_v14 = vmul.f32 %v653_v35, %v597_v55 }
 0x1ad   : > { %v682_v50 = vmul.f32 %v665_v46, %v601_v26 }
 0x1ae   : > { %694 = vst [vmem:[#allocation7 + $0x58] sm:$0xff] %v678_v14 }
 0x1af   : > { %698 = vst [vmem:[#allocation7 + $0x78] sm:$0xff] %v682_v50 }
 0x1b0 PF: > { %p893_p8 = scmp.eq.s32.totalorder %s1066_s13, 2  ;;  %s706_s27 = sshll.u32 %s1807_s2, 4  ;;  %s707_s27 = int_to_ptr.hbm [resolvable:$true] %s706_s27 }
 0x1b1   : > { %s1039_s28 = smov [#allocation7]   ;;  %s1040_s30 = smov 128  }
 0x1b2   : > { %s704_s29 = sshll.u32 %s1039_s28, 4  ;;  %s1041_s3 = smov 8   ;;  %s705_s29 = int_to_ptr.vmem [resolvable:$true] %s704_s29 }
 0x1b3   : > { %879 = dma.vmem_to_hbm [thread:$0]  (%p893_p8), %s705_s29, 2048, %s707_s27, [#allocation4], %s1040_s30, %s1040_s30, %s1041_s3  }
 0x1b4   : > { %1028 = dma.done.wait (%p893_p8), [#allocation4], 2048  }
 0x1b5   : > { %1030 = vsyncadd (%p893_p8), [#allocation4], 4294965248 }
 0x1b6 PF: > { %s15_s9 = sadd.s32 1, %s1033_s9  }
 0x1b7   : > { %p12_p9 = scmp.ge.s32.totalorder %s15_s9, 5  }
 0x1b9   :  { %14 = sbr.rel (!%p12_p9) target bundleno = 3 (0x3), region = 70 }
 0x1be   :  { %723 = vsyncpa [#allocation3], 1 }
 0x1bf   :  { %725 = vsyncpa [#allocation3 + $0x1], 1 }
 0x1c0   :  { %726 = vsyncpa [#allocation4], 1 }
 0x1c1   :  { %728 = vsyncpa [#allocation4 + $0x1], 1 }
 0x1c2   :  { %729 = vsyncpa [#allocation5], 1 }
 0x1c3   :  { %731 = vsyncpa [#allocation5 + $0x1], 1 }

</bundles_post_ra>
